<compile_context>
chip_gen: v5e
topology: v5e:2x2
jax: 0.10.0
libtpu: 0.0.40
codegen_flags: <defaults>
</compile_context>

<pallas_src>
import jax
import jax.numpy as jnp
from jax import lax
from jax.experimental import pallas as pl
from jax.experimental.pallas import tpu as pltpu


def lstm_last_kernel(x_ref, wih_ref, whh_ref, b_ref, out_ref):
    """Single invocation: time-major sequence resident in VMEM.

    x_ref  : (T*B, D)   time-major flattened input (t major, b minor)
    wih_ref: (D, 4H)    input->gates weight (pre-transposed)
    whh_ref: (H, 4H)    hidden->gates weight (pre-transposed)
    b_ref  : (1, 4H)    folded bias (b_ih + b_hh)
    out_ref: (B, H)     last-timestep hidden state
    """
    B, H = out_ref.shape
    TB, _ = x_ref.shape
    T = TB // B

    # ---- Phase 1: batched input projection for ALL timesteps (off the serial
    # chain, so HIGHEST precision is affordable here).
    gx = jnp.dot(x_ref[...], wih_ref[...],
                 precision=lax.Precision.HIGHEST,
                 preferred_element_type=jnp.float32) + b_ref[...]     # (T*B, 4H)

    whh = whh_ref[...]                                                # (H, 4H)

    h = jnp.zeros((B, H), jnp.float32)
    c = jnp.zeros((B, H), jnp.float32)

    # ---- Phase 2: serial recurrence, unrolled at trace time (T static, small).
    for t in range(T):
        # Static contiguous sublane slice — no mid-axis gather.
        gates = gx[t * B:(t + 1) * B, :] + jnp.dot(
            h, whh,
            precision=lax.Precision.DEFAULT,        # one MXU pass on crit path
            preferred_element_type=jnp.float32)                       # (B, 4H)
        # sigmoid(x) = 0.5*(tanh(0.5 x)+1): exactly one EUP pass for i/f/o.
        s = 0.5 * (jnp.tanh(0.5 * gates) + 1.0)
        tg = jnp.tanh(gates)
        i = s[:, 0 * H:1 * H]
        f = s[:, 1 * H:2 * H]
        g = tg[:, 2 * H:3 * H]
        o = s[:, 3 * H:4 * H]
        c = f * c + i * g
        h = o * jnp.tanh(c)

    out_ref[...] = h.astype(out_ref.dtype)


def lstm_output_forward(x, w_ih_t, w_hh_t, bias):
    """x: (B, T, D) f32; w_ih_t: (D, 4H); w_hh_t: (H, 4H); bias: (1, 4H).
    Returns (B, H) = last-timestep LSTM hidden state (zero initial state)."""
    B, T, D = x.shape
    H = w_hh_t.shape[0]
    G = 4 * H
    if T == 0:
        # Degenerate case: PyTorch would error; return the zero initial state.
        return jnp.zeros((B, H), jnp.float32)

    # Layout plumbing in the wrapper: time-major (T*B, D) so per-step gate
    # blocks are contiguous sublane slices inside the kernel.
    x_tm = jnp.transpose(x, (1, 0, 2)).reshape(T * B, D)

    flops = 2 * B * T * D * G + 2 * T * B * H * G
    transcendentals = T * (2 * B * G + B * H)       # tanh(0.5g), tanh(g), tanh(c)
    bytes_accessed = 4 * (T * B * D + D * G + H * G + G + B * H)

    vmem = pl.BlockSpec(memory_space=pltpu.MemorySpace.VMEM)
    return pl.pallas_call(
        lstm_last_kernel,
        out_shape=jax.ShapeDtypeStruct((B, H), jnp.float32),
        in_specs=[vmem, vmem, vmem, vmem],
        out_specs=vmem,
        cost_estimate=pl.CostEstimate(
            flops=flops,
            transcendentals=transcendentals,
            bytes_accessed=bytes_accessed),
    )(x_tm, w_ih_t, w_hh_t, bias)


def lstm_output_reference(x, w_ih_t, w_hh_t, bias):
    """Pure-JAX reference (PyTorch LSTM semantics, zero initial state),
    using the same per-matmul precision choices as the kernel."""
    B, T, D = x.shape
    H = w_hh_t.shape[0]
    gx = jnp.dot(x.reshape(B * T, D), w_ih_t,
                 precision=lax.Precision.HIGHEST) + bias
    gx = gx.reshape(B, T, 4 * H)
    h = jnp.zeros((B, H), jnp.float32)
    c = jnp.zeros((B, H), jnp.float32)
    for t in range(T):
        gates = gx[:, t, :] + jnp.dot(h, w_hh_t,
                                      precision=lax.Precision.DEFAULT)
        i = jax.nn.sigmoid(gates[:, 0 * H:1 * H])
        f = jax.nn.sigmoid(gates[:, 1 * H:2 * H])
        g = jnp.tanh(gates[:, 2 * H:3 * H])
        o = jax.nn.sigmoid(gates[:, 3 * H:4 * H])
        c = f * c + i * g
        h = o * jnp.tanh(c)
    return h


if __name__ == "__main__":
    # Small shapes consistent with the module.
    state_dim, action_dim, hidden = 4, 4, 32
    B, T, D = 2, 8, state_dim + action_dim

    key = jax.random.PRNGKey(0)
    k_x, k_wih, k_whh, k_bih, k_bhh = jax.random.split(key, 5)

    # Deterministic parameter init, matching PyTorch LSTM's U(-1/sqrt(H), 1/sqrt(H)).
    bound = 1.0 / jnp.sqrt(jnp.float32(hidden))
    w_ih = jax.random.uniform(k_wih, (4 * hidden, D), jnp.float32, -bound, bound)
    w_hh = jax.random.uniform(k_whh, (4 * hidden, hidden), jnp.float32, -bound, bound)
    b_ih = jax.random.uniform(k_bih, (4 * hidden,), jnp.float32, -bound, bound)
    b_hh = jax.random.uniform(k_bhh, (4 * hidden,), jnp.float32, -bound, bound)

    # Pre-transpose for x @ W; fold both biases together (PyTorch gate order i,f,g,o).
    w_ih_t = w_ih.T                                # (D, 4H)
    w_hh_t = w_hh.T                                # (H, 4H)
    bias = (b_ih + b_hh).reshape(1, 4 * hidden)    # (1, 4H)

    x = jax.random.normal(k_x, (B, T, D), jnp.float32)

    out = lstm_output_forward(x, w_ih_t, w_hh_t, bias)
    out = jax.block_until_ready(out)

    ref = lstm_output_reference(x, w_ih_t, w_hh_t, bias)
    assert out.shape == (B, hidden)
    assert jnp.allclose(out, ref, atol=2e-5, rtol=2e-5), "mismatch vs reference"

    # Note: self.linear (Linear+ReLU) is unused in the module's forward, so it is
    # intentionally not part of the kernel.
    print("KERNEL_OK")
</pallas_src>

<mosaic_0001>
module attributes {stable_mosaic.version = 11 : i64} {
  func.func @lstm_last_kernel(%arg0: memref<16x8xf32, #tpu.memory_space<vmem>>, %arg1: memref<8x128xf32, #tpu.memory_space<vmem>>, %arg2: memref<32x128xf32, #tpu.memory_space<vmem>>, %arg3: memref<1x128xf32, #tpu.memory_space<vmem>>, %arg4: memref<2x32xf32, #tpu.memory_space<vmem>>) attributes {dimension_semantics = [], scalar_prefetch = 0 : i64, scratch_operands = 0 : i64, tpu.core_type = #tpu.core_type<tc>} {
    %c0 = arith.constant 0 : index
    %c0_0 = arith.constant 0 : index
    %0 = vector.load %arg0[%c0, %c0_0] : memref<16x8xf32, #tpu.memory_space<vmem>>, vector<16x8xf32>
    %c0_1 = arith.constant 0 : index
    %c0_2 = arith.constant 0 : index
    %1 = vector.load %arg1[%c0_1, %c0_2] : memref<8x128xf32, #tpu.memory_space<vmem>>, vector<8x128xf32>
    %cst = arith.constant dense<0.000000e+00> : vector<16x128xf32>
    %2 = tpu.matmul %0, %1, %cst {dimension_numbers = #tpu.dot_dimension_numbers<[1], [0], [0], [1], [0, 0, 1, 1], [], []>, precision = #tpu.contract_precision<fp32>} : vector<16x8xf32>, vector<8x128xf32>, vector<16x128xf32> -> vector<16x128xf32>
    %c0_3 = arith.constant 0 : index
    %c0_4 = arith.constant 0 : index
    %3 = vector.load %arg3[%c0_3, %c0_4] : memref<1x128xf32, #tpu.memory_space<vmem>>, vector<1x128xf32>
    %4 = vector.broadcast %3 : vector<1x128xf32> to vector<16x128xf32>
    %5 = arith.addf %2, %4 : vector<16x128xf32>
    %c0_5 = arith.constant 0 : index
    %c0_6 = arith.constant 0 : index
    %6 = vector.load %arg2[%c0_5, %c0_6] : memref<32x128xf32, #tpu.memory_space<vmem>>, vector<32x128xf32>
    %cst_7 = arith.constant 0.000000e+00 : f32
    %7 = vector.broadcast %cst_7 : f32 to vector<2x32xf32>
    %cst_8 = arith.constant 0.000000e+00 : f32
    %8 = vector.broadcast %cst_8 : f32 to vector<2x32xf32>
    %9 = vector.extract_strided_slice %5 {offsets = [0, 0], sizes = [2, 128], strides = [1, 1]} : vector<16x128xf32> to vector<2x128xf32>
    %cst_9 = arith.constant dense<0.000000e+00> : vector<2x128xf32>
    %10 = tpu.matmul %7, %6, %cst_9 {dimension_numbers = #tpu.dot_dimension_numbers<[1], [0], [0], [1], [0, 0, 1, 1], [], []>} : vector<2x32xf32>, vector<32x128xf32>, vector<2x128xf32> -> vector<2x128xf32>
    %11 = arith.addf %9, %10 : vector<2x128xf32>
    %cst_10 = arith.constant 5.000000e-01 : f32
    %12 = vector.broadcast %cst_10 : f32 to vector<2x128xf32>
    %13 = arith.mulf %12, %11 : vector<2x128xf32>
    %14 = math.tanh %13 : vector<2x128xf32>
    %cst_11 = arith.constant 1.000000e+00 : f32
    %15 = vector.broadcast %cst_11 : f32 to vector<2x128xf32>
    %16 = arith.addf %14, %15 : vector<2x128xf32>
    %cst_12 = arith.constant 5.000000e-01 : f32
    %17 = vector.broadcast %cst_12 : f32 to vector<2x128xf32>
    %18 = arith.mulf %17, %16 : vector<2x128xf32>
    %19 = math.tanh %11 : vector<2x128xf32>
    %20 = vector.extract_strided_slice %18 {offsets = [0, 0], sizes = [2, 32], strides = [1, 1]} : vector<2x128xf32> to vector<2x32xf32>
    %21 = vector.extract_strided_slice %18 {offsets = [0, 32], sizes = [2, 32], strides = [1, 1]} : vector<2x128xf32> to vector<2x32xf32>
    %22 = vector.extract_strided_slice %19 {offsets = [0, 64], sizes = [2, 32], strides = [1, 1]} : vector<2x128xf32> to vector<2x32xf32>
    %23 = vector.extract_strided_slice %18 {offsets = [0, 96], sizes = [2, 32], strides = [1, 1]} : vector<2x128xf32> to vector<2x32xf32>
    %24 = arith.mulf %21, %8 : vector<2x32xf32>
    %25 = arith.mulf %20, %22 : vector<2x32xf32>
    %26 = arith.addf %24, %25 : vector<2x32xf32>
    %27 = math.tanh %26 : vector<2x32xf32>
    %28 = arith.mulf %23, %27 : vector<2x32xf32>
    %29 = vector.extract_strided_slice %5 {offsets = [2, 0], sizes = [2, 128], strides = [1, 1]} : vector<16x128xf32> to vector<2x128xf32>
    %cst_13 = arith.constant dense<0.000000e+00> : vector<2x128xf32>
    %30 = tpu.matmul %28, %6, %cst_13 {dimension_numbers = #tpu.dot_dimension_numbers<[1], [0], [0], [1], [0, 0, 1, 1], [], []>} : vector<2x32xf32>, vector<32x128xf32>, vector<2x128xf32> -> vector<2x128xf32>
    %31 = arith.addf %29, %30 : vector<2x128xf32>
    %cst_14 = arith.constant 5.000000e-01 : f32
    %32 = vector.broadcast %cst_14 : f32 to vector<2x128xf32>
    %33 = arith.mulf %32, %31 : vector<2x128xf32>
    %34 = math.tanh %33 : vector<2x128xf32>
    %cst_15 = arith.constant 1.000000e+00 : f32
    %35 = vector.broadcast %cst_15 : f32 to vector<2x128xf32>
    %36 = arith.addf %34, %35 : vector<2x128xf32>
    %cst_16 = arith.constant 5.000000e-01 : f32
    %37 = vector.broadcast %cst_16 : f32 to vector<2x128xf32>
    %38 = arith.mulf %37, %36 : vector<2x128xf32>
    %39 = math.tanh %31 : vector<2x128xf32>
    %40 = vector.extract_strided_slice %38 {offsets = [0, 0], sizes = [2, 32], strides = [1, 1]} : vector<2x128xf32> to vector<2x32xf32>
    %41 = vector.extract_strided_slice %38 {offsets = [0, 32], sizes = [2, 32], strides = [1, 1]} : vector<2x128xf32> to vector<2x32xf32>
    %42 = vector.extract_strided_slice %39 {offsets = [0, 64], sizes = [2, 32], strides = [1, 1]} : vector<2x128xf32> to vector<2x32xf32>
    %43 = vector.extract_strided_slice %38 {offsets = [0, 96], sizes = [2, 32], strides = [1, 1]} : vector<2x128xf32> to vector<2x32xf32>
    %44 = arith.mulf %41, %26 : vector<2x32xf32>
    %45 = arith.mulf %40, %42 : vector<2x32xf32>
    %46 = arith.addf %44, %45 : vector<2x32xf32>
    %47 = math.tanh %46 : vector<2x32xf32>
    %48 = arith.mulf %43, %47 : vector<2x32xf32>
    %49 = vector.extract_strided_slice %5 {offsets = [4, 0], sizes = [2, 128], strides = [1, 1]} : vector<16x128xf32> to vector<2x128xf32>
    %cst_17 = arith.constant dense<0.000000e+00> : vector<2x128xf32>
    %50 = tpu.matmul %48, %6, %cst_17 {dimension_numbers = #tpu.dot_dimension_numbers<[1], [0], [0], [1], [0, 0, 1, 1], [], []>} : vector<2x32xf32>, vector<32x128xf32>, vector<2x128xf32> -> vector<2x128xf32>
    %51 = arith.addf %49, %50 : vector<2x128xf32>
    %cst_18 = arith.constant 5.000000e-01 : f32
    %52 = vector.broadcast %cst_18 : f32 to vector<2x128xf32>
    %53 = arith.mulf %52, %51 : vector<2x128xf32>
    %54 = math.tanh %53 : vector<2x128xf32>
    %cst_19 = arith.constant 1.000000e+00 : f32
    %55 = vector.broadcast %cst_19 : f32 to vector<2x128xf32>
    %56 = arith.addf %54, %55 : vector<2x128xf32>
    %cst_20 = arith.constant 5.000000e-01 : f32
    %57 = vector.broadcast %cst_20 : f32 to vector<2x128xf32>
    %58 = arith.mulf %57, %56 : vector<2x128xf32>
    %59 = math.tanh %51 : vector<2x128xf32>
    %60 = vector.extract_strided_slice %58 {offsets = [0, 0], sizes = [2, 32], strides = [1, 1]} : vector<2x128xf32> to vector<2x32xf32>
    %61 = vector.extract_strided_slice %58 {offsets = [0, 32], sizes = [2, 32], strides = [1, 1]} : vector<2x128xf32> to vector<2x32xf32>
    %62 = vector.extract_strided_slice %59 {offsets = [0, 64], sizes = [2, 32], strides = [1, 1]} : vector<2x128xf32> to vector<2x32xf32>
    %63 = vector.extract_strided_slice %58 {offsets = [0, 96], sizes = [2, 32], strides = [1, 1]} : vector<2x128xf32> to vector<2x32xf32>
    %64 = arith.mulf %61, %46 : vector<2x32xf32>
    %65 = arith.mulf %60, %62 : vector<2x32xf32>
    %66 = arith.addf %64, %65 : vector<2x32xf32>
    %67 = math.tanh %66 : vector<2x32xf32>
    %68 = arith.mulf %63, %67 : vector<2x32xf32>
    %69 = vector.extract_strided_slice %5 {offsets = [6, 0], sizes = [2, 128], strides = [1, 1]} : vector<16x128xf32> to vector<2x128xf32>
    %cst_21 = arith.constant dense<0.000000e+00> : vector<2x128xf32>
    %70 = tpu.matmul %68, %6, %cst_21 {dimension_numbers = #tpu.dot_dimension_numbers<[1], [0], [0], [1], [0, 0, 1, 1], [], []>} : vector<2x32xf32>, vector<32x128xf32>, vector<2x128xf32> -> vector<2x128xf32>
    %71 = arith.addf %69, %70 : vector<2x128xf32>
    %cst_22 = arith.constant 5.000000e-01 : f32
    %72 = vector.broadcast %cst_22 : f32 to vector<2x128xf32>
    %73 = arith.mulf %72, %71 : vector<2x128xf32>
    %74 = math.tanh %73 : vector<2x128xf32>
    %cst_23 = arith.constant 1.000000e+00 : f32
    %75 = vector.broadcast %cst_23 : f32 to vector<2x128xf32>
    %76 = arith.addf %74, %75 : vector<2x128xf32>
    %cst_24 = arith.constant 5.000000e-01 : f32
    %77 = vector.broadcast %cst_24 : f32 to vector<2x128xf32>
    %78 = arith.mulf %77, %76 : vector<2x128xf32>
    %79 = math.tanh %71 : vector<2x128xf32>
    %80 = vector.extract_strided_slice %78 {offsets = [0, 0], sizes = [2, 32], strides = [1, 1]} : vector<2x128xf32> to vector<2x32xf32>
    %81 = vector.extract_strided_slice %78 {offsets = [0, 32], sizes = [2, 32], strides = [1, 1]} : vector<2x128xf32> to vector<2x32xf32>
    %82 = vector.extract_strided_slice %79 {offsets = [0, 64], sizes = [2, 32], strides = [1, 1]} : vector<2x128xf32> to vector<2x32xf32>
    %83 = vector.extract_strided_slice %78 {offsets = [0, 96], sizes = [2, 32], strides = [1, 1]} : vector<2x128xf32> to vector<2x32xf32>
    %84 = arith.mulf %81, %66 : vector<2x32xf32>
    %85 = arith.mulf %80, %82 : vector<2x32xf32>
    %86 = arith.addf %84, %85 : vector<2x32xf32>
    %87 = math.tanh %86 : vector<2x32xf32>
    %88 = arith.mulf %83, %87 : vector<2x32xf32>
    %89 = vector.extract_strided_slice %5 {offsets = [8, 0], sizes = [2, 128], strides = [1, 1]} : vector<16x128xf32> to vector<2x128xf32>
    %cst_25 = arith.constant dense<0.000000e+00> : vector<2x128xf32>
    %90 = tpu.matmul %88, %6, %cst_25 {dimension_numbers = #tpu.dot_dimension_numbers<[1], [0], [0], [1], [0, 0, 1, 1], [], []>} : vector<2x32xf32>, vector<32x128xf32>, vector<2x128xf32> -> vector<2x128xf32>
    %91 = arith.addf %89, %90 : vector<2x128xf32>
    %cst_26 = arith.constant 5.000000e-01 : f32
    %92 = vector.broadcast %cst_26 : f32 to vector<2x128xf32>
    %93 = arith.mulf %92, %91 : vector<2x128xf32>
    %94 = math.tanh %93 : vector<2x128xf32>
    %cst_27 = arith.constant 1.000000e+00 : f32
    %95 = vector.broadcast %cst_27 : f32 to vector<2x128xf32>
    %96 = arith.addf %94, %95 : vector<2x128xf32>
    %cst_28 = arith.constant 5.000000e-01 : f32
    %97 = vector.broadcast %cst_28 : f32 to vector<2x128xf32>
    %98 = arith.mulf %97, %96 : vector<2x128xf32>
    %99 = math.tanh %91 : vector<2x128xf32>
    %100 = vector.extract_strided_slice %98 {offsets = [0, 0], sizes = [2, 32], strides = [1, 1]} : vector<2x128xf32> to vector<2x32xf32>
    %101 = vector.extract_strided_slice %98 {offsets = [0, 32], sizes = [2, 32], strides = [1, 1]} : vector<2x128xf32> to vector<2x32xf32>
    %102 = vector.extract_strided_slice %99 {offsets = [0, 64], sizes = [2, 32], strides = [1, 1]} : vector<2x128xf32> to vector<2x32xf32>
    %103 = vector.extract_strided_slice %98 {offsets = [0, 96], sizes = [2, 32], strides = [1, 1]} : vector<2x128xf32> to vector<2x32xf32>
    %104 = arith.mulf %101, %86 : vector<2x32xf32>
    %105 = arith.mulf %100, %102 : vector<2x32xf32>
    %106 = arith.addf %104, %105 : vector<2x32xf32>
    %107 = math.tanh %106 : vector<2x32xf32>
    %108 = arith.mulf %103, %107 : vector<2x32xf32>
    %109 = vector.extract_strided_slice %5 {offsets = [10, 0], sizes = [2, 128], strides = [1, 1]} : vector<16x128xf32> to vector<2x128xf32>
    %cst_29 = arith.constant dense<0.000000e+00> : vector<2x128xf32>
    %110 = tpu.matmul %108, %6, %cst_29 {dimension_numbers = #tpu.dot_dimension_numbers<[1], [0], [0], [1], [0, 0, 1, 1], [], []>} : vector<2x32xf32>, vector<32x128xf32>, vector<2x128xf32> -> vector<2x128xf32>
    %111 = arith.addf %109, %110 : vector<2x128xf32>
    %cst_30 = arith.constant 5.000000e-01 : f32
    %112 = vector.broadcast %cst_30 : f32 to vector<2x128xf32>
    %113 = arith.mulf %112, %111 : vector<2x128xf32>
    %114 = math.tanh %113 : vector<2x128xf32>
    %cst_31 = arith.constant 1.000000e+00 : f32
    %115 = vector.broadcast %cst_31 : f32 to vector<2x128xf32>
    %116 = arith.addf %114, %115 : vector<2x128xf32>
    %cst_32 = arith.constant 5.000000e-01 : f32
    %117 = vector.broadcast %cst_32 : f32 to vector<2x128xf32>
    %118 = arith.mulf %117, %116 : vector<2x128xf32>
    %119 = math.tanh %111 : vector<2x128xf32>
    %120 = vector.extract_strided_slice %118 {offsets = [0, 0], sizes = [2, 32], strides = [1, 1]} : vector<2x128xf32> to vector<2x32xf32>
    %121 = vector.extract_strided_slice %118 {offsets = [0, 32], sizes = [2, 32], strides = [1, 1]} : vector<2x128xf32> to vector<2x32xf32>
    %122 = vector.extract_strided_slice %119 {offsets = [0, 64], sizes = [2, 32], strides = [1, 1]} : vector<2x128xf32> to vector<2x32xf32>
    %123 = vector.extract_strided_slice %118 {offsets = [0, 96], sizes = [2, 32], strides = [1, 1]} : vector<2x128xf32> to vector<2x32xf32>
    %124 = arith.mulf %121, %106 : vector<2x32xf32>
    %125 = arith.mulf %120, %122 : vector<2x32xf32>
    %126 = arith.addf %124, %125 : vector<2x32xf32>
    %127 = math.tanh %126 : vector<2x32xf32>
    %128 = arith.mulf %123, %127 : vector<2x32xf32>
    %129 = vector.extract_strided_slice %5 {offsets = [12, 0], sizes = [2, 128], strides = [1, 1]} : vector<16x128xf32> to vector<2x128xf32>
    %cst_33 = arith.constant dense<0.000000e+00> : vector<2x128xf32>
    %130 = tpu.matmul %128, %6, %cst_33 {dimension_numbers = #tpu.dot_dimension_numbers<[1], [0], [0], [1], [0, 0, 1, 1], [], []>} : vector<2x32xf32>, vector<32x128xf32>, vector<2x128xf32> -> vector<2x128xf32>
    %131 = arith.addf %129, %130 : vector<2x128xf32>
    %cst_34 = arith.constant 5.000000e-01 : f32
    %132 = vector.broadcast %cst_34 : f32 to vector<2x128xf32>
    %133 = arith.mulf %132, %131 : vector<2x128xf32>
    %134 = math.tanh %133 : vector<2x128xf32>
    %cst_35 = arith.constant 1.000000e+00 : f32
    %135 = vector.broadcast %cst_35 : f32 to vector<2x128xf32>
    %136 = arith.addf %134, %135 : vector<2x128xf32>
    %cst_36 = arith.constant 5.000000e-01 : f32
    %137 = vector.broadcast %cst_36 : f32 to vector<2x128xf32>
    %138 = arith.mulf %137, %136 : vector<2x128xf32>
    %139 = math.tanh %131 : vector<2x128xf32>
    %140 = vector.extract_strided_slice %138 {offsets = [0, 0], sizes = [2, 32], strides = [1, 1]} : vector<2x128xf32> to vector<2x32xf32>
    %141 = vector.extract_strided_slice %138 {offsets = [0, 32], sizes = [2, 32], strides = [1, 1]} : vector<2x128xf32> to vector<2x32xf32>
    %142 = vector.extract_strided_slice %139 {offsets = [0, 64], sizes = [2, 32], strides = [1, 1]} : vector<2x128xf32> to vector<2x32xf32>
    %143 = vector.extract_strided_slice %138 {offsets = [0, 96], sizes = [2, 32], strides = [1, 1]} : vector<2x128xf32> to vector<2x32xf32>
    %144 = arith.mulf %141, %126 : vector<2x32xf32>
    %145 = arith.mulf %140, %142 : vector<2x32xf32>
    %146 = arith.addf %144, %145 : vector<2x32xf32>
    %147 = math.tanh %146 : vector<2x32xf32>
    %148 = arith.mulf %143, %147 : vector<2x32xf32>
    %149 = vector.extract_strided_slice %5 {offsets = [14, 0], sizes = [2, 128], strides = [1, 1]} : vector<16x128xf32> to vector<2x128xf32>
    %cst_37 = arith.constant dense<0.000000e+00> : vector<2x128xf32>
    %150 = tpu.matmul %148, %6, %cst_37 {dimension_numbers = #tpu.dot_dimension_numbers<[1], [0], [0], [1], [0, 0, 1, 1], [], []>} : vector<2x32xf32>, vector<32x128xf32>, vector<2x128xf32> -> vector<2x128xf32>
    %151 = arith.addf %149, %150 : vector<2x128xf32>
    %cst_38 = arith.constant 5.000000e-01 : f32
    %152 = vector.broadcast %cst_38 : f32 to vector<2x128xf32>
    %153 = arith.mulf %152, %151 : vector<2x128xf32>
    %154 = math.tanh %153 : vector<2x128xf32>
    %cst_39 = arith.constant 1.000000e+00 : f32
    %155 = vector.broadcast %cst_39 : f32 to vector<2x128xf32>
    %156 = arith.addf %154, %155 : vector<2x128xf32>
    %cst_40 = arith.constant 5.000000e-01 : f32
    %157 = vector.broadcast %cst_40 : f32 to vector<2x128xf32>
    %158 = arith.mulf %157, %156 : vector<2x128xf32>
    %159 = math.tanh %151 : vector<2x128xf32>
    %160 = vector.extract_strided_slice %158 {offsets = [0, 0], sizes = [2, 32], strides = [1, 1]} : vector<2x128xf32> to vector<2x32xf32>
    %161 = vector.extract_strided_slice %158 {offsets = [0, 32], sizes = [2, 32], strides = [1, 1]} : vector<2x128xf32> to vector<2x32xf32>
    %162 = vector.extract_strided_slice %159 {offsets = [0, 64], sizes = [2, 32], strides = [1, 1]} : vector<2x128xf32> to vector<2x32xf32>
    %163 = vector.extract_strided_slice %158 {offsets = [0, 96], sizes = [2, 32], strides = [1, 1]} : vector<2x128xf32> to vector<2x32xf32>
    %164 = arith.mulf %161, %146 : vector<2x32xf32>
    %165 = arith.mulf %160, %162 : vector<2x32xf32>
    %166 = arith.addf %164, %165 : vector<2x32xf32>
    %167 = math.tanh %166 : vector<2x32xf32>
    %168 = arith.mulf %163, %167 : vector<2x32xf32>
    %c0_41 = arith.constant 0 : index
    %c0_42 = arith.constant 0 : index
    %169 = vector.load %arg4[%c0_41, %c0_42] : memref<2x32xf32, #tpu.memory_space<vmem>>, vector<2x32xf32>
    tpu.vector_store %arg4[%c0_41, %c0_42], %168 {strides = array<i32>} : memref<2x32xf32, #tpu.memory_space<vmem>>, vector<2x32xf32>,
    return
  }
}

</mosaic_0001>

<bundles_post_ra>
// kernel: tpu_custom_call.1
= control target key start
LH: loop header
LB: loop body
LE: loop exit
PB: predicated region body
PF: predicated region fallthrough
CT: control target
= control target key end

     0   :  { %9 = vsyncpa [#allocation3], 0  ;;  %s941_s0 = inlined_call_operand.vmem [shape: f32[16,8], index: 0, kind: input, shape index: {}]   ;;  %s942_s1 = inlined_call_operand.vmem [shape: f32[8,128], index: 1, kind: input, shape index: {}]   ;;  %s943_s2 = inlined_call_operand.hbm [shape: f32[32,128], index: 2, kind: input, shape index: {}]   ;;  %s944_s3 = inlined_call_operand.vmem [shape: f32[1,128], index: 3, kind: input, shape index: {}]   ;;  %s945_s4 = inlined_call_operand.hbm [shape: f32[2,32], index: 4, kind: output, shape index: {}]  }
   0x1   :  { %10 = vsyncpa [#allocation4], 0  ;;  %s19_s17 = sshll.u32 %s943_s2, 4  ;;  %s794_s18 = smov [#allocation2]   ;;  %s20_s17 = int_to_ptr.hbm [resolvable:$true] %s19_s17 }
   0x2   :  { %s21_s19 = sshll.u32 %s794_s18, 4  ;;  %s795_s20 = smov 128   ;;  %s22_s19 = int_to_ptr.vmem [resolvable:$true] %s21_s19 }
   0x3   :  { %s796_s21 = smov 8  }
   0x4   :  { %27 = dma.hbm_to_vmem [thread:$0]  %s20_s17, 512, %s22_s19, [#allocation3], %s795_s20, %s795_s20, %s796_s21  }
   0x5   :  { %790 = dma.done.wait [#allocation3], 512  }
   0x6   :  { %791 = vsyncadd [#allocation3], 4294966784  ;;  %vm41_vm0 = vcmask 64512   ;;  %v36_v0 = vld [vmem:[%s942_s1] sm:$0xff]  ;;  %v35_v4 = vld [vmem:[%s941_s0 + $0x8] sm:$0xff]  ;;  %v797_v24 = vmov 0.0  }
   0x7   :  { %v34_v1 = vld [vmem:[%s941_s0] sm:$0xff]  ;;  %v63_v2 = vand.u32 4294901760, %v36_v0  ;;  %v46_v6 = vsel %vm41_vm0, %v35_v4, 0  ;;  %v838_v8 = vld [vmem:[#allocation2 + $0x18] sm:$0xff]  ;;  %v841_v12 = vld [vmem:[#allocation2 + $0x10] sm:$0xff]  ;;  %s799_s27 = smov 32  }
   0x8   :  { %v43_v3 = vsel %vm41_vm0, %v34_v1, 0  ;;  %v73_v9 = vand.u32 4294901760, %v46_v6  ;;  %v845_v17 = vld [vmem:[#allocation2 + $0x8] sm:$0xff]  ;;  %v849_v21 = vld [vmem:[#allocation2] sm:$0xff]  ;;  %vm229_vm1 = vcmask 261120   ;;  %s800_s28 = smov [#allocation5]  }
   0x9   :  { %v65_v5 = vand.u32 4294901760, %v43_v3  ;;  %v98_v7 = vsub.f32 %v36_v0, %v63_v2  ;;  %64 = vmatpush.msra.mxu0 %v63_v2  ;;  %157 = vmatpush.msra.mxu3 %v63_v2  ;;  %v693_v25 = vld [vmem:[%s944_s3] ss:$0 sm:$0xff]  ;;  %s798_s3 = smov 64   ;;  %s667_s29 = sshll.u32 %s800_s28, 4  ;;  %vm660_vm2 = vcmask 261126   ;;  %s668_s29 = int_to_ptr.vmem [resolvable:$true] %s667_s29 }
   0xa   :  { %v74_v13 = vsub.f32 %v46_v6, %v73_v9  ;;  %s669_s6 = sshll.u32 %s945_s4, 4  ;;  %s670_s6 = int_to_ptr.hbm [resolvable:$true] %s669_s6 }
   0xb   :  { %v66_v10 = vsub.f32 %v43_v3, %v65_v5  ;;  %293 = vmatpush.msrb.mxu3 %v838_v8  ;;  %129 = vmatpush.msra.mxu2 %v98_v7  ;;  %v99_v11 = vand.u32 4294901760, %v98_v7 }
   0xc   :  { %v75_v18 = vand.u32 4294901760, %v74_v13 }
   0xd   :  { %132 = vmatmul.f32.vlgmr.msra.gmra.mxu2 %v66_v10  ;;  %v67_v14 = vand.u32 4294901760, %v66_v10  ;;  %294 = vmatpush.msrb.mxu3 %v841_v12  ;;  %v100_v15 = vsub.f32 %v98_v7, %v99_v11 }
   0xe   :  { %245 = vmatpush.msrb.mxu2 %v838_v8  ;;  %189 = vmatpush.msrb.mxu0 %v99_v11  ;;  %v76_v22 = vsub.f32 %v74_v13, %v75_v18 }
   0xf   :  { %v68_v16 = vsub.f32 %v66_v10, %v67_v14  ;;  %161 = vmatmul.f32.vlgmr.msra.gmra.mxu3 %v67_v14  ;;  %v101_v19 = vand.u32 4294901760, %v100_v15 }
  0x10   :  { %246 = vmatpush.msrb.mxu2 %v841_v12  ;;  %295 = vmatpush.msrb.mxu3 %v845_v17  ;;  %v77_v23 = vand.u32 4294901760, %v76_v22 }
  0x11   :  { %v69_v20 = vand.u32 4294901760, %v68_v16  ;;  %102 = vmatpush.msra.mxu1 %v101_v19 }
  0x12   :  { %247 = vmatpush.msrb.mxu2 %v845_v17  ;;  %104 = vmatmul.f32.vlgmr.msra.gmra.mxu1 %v65_v5 }
  0x13   :  { %70 = vmatmul.f32.vlgmr.msra.gmra.mxu0 %v69_v20  ;;  %215 = vmatpush.msrb.mxu1 %v63_v2 }
  0x14   :  { %248 = vmatpush.msrb.mxu2 %v849_v21  ;;  %296 = vmatpush.msrb.mxu3 %v849_v21 }
  0x15   :  { %137 = vmatmul.f32.gmra.mxu2 %v74_v13  ;;  %458 = vmatpush.msra.mxu0 %v838_v8 }
  0x16   :  { %348 = vmatpush.msra.mxu2 %v838_v8  ;;  %403 = vmatpush.msra.mxu3 %v838_v8 }
  0x17   :  { %167 = vmatmul.f32.gmra.mxu3 %v75_v18  ;;  %459 = vmatpush.msra.mxu0 %v841_v12 }
  0x18   :  { %349 = vmatpush.msra.mxu2 %v841_v12  ;;  %404 = vmatpush.msra.mxu3 %v841_v12 }
  0x19   :  { %509 = vmatpush.msra.mxu1 %v838_v8  ;;  %460 = vmatpush.msra.mxu0 %v845_v17 }
  0x1a   :  { %350 = vmatpush.msra.mxu2 %v845_v17  ;;  %405 = vmatpush.msra.mxu3 %v845_v17 }
  0x1b   :  { %78 = vmatmul.f32.gmra.mxu0 %v77_v23  ;;  %108 = vmatmul.f32.gmra.mxu1 %v73_v9 }
  0x1c   :  { %351 = vmatpush.msra.mxu2 %v849_v21  ;;  %406 = vmatpush.msra.mxu3 %v849_v21 }
  0x1d   :  { %249 = vmatmul.f32.vlgmr.msrb.gmra.mxu2 %v797_v24  ;;  %510 = vmatpush.msra.mxu1 %v841_v12 }
  0x1e   :  { %564 = vmatpush.msrb.mxu2 %v838_v8  ;;  %461 = vmatpush.msra.mxu0 %v849_v21 }
  0x1f   :  { %511 = vmatpush.msra.mxu1 %v845_v17 }
  0x20   :  { %565 = vmatpush.msrb.mxu2 %v841_v12 }
  0x21   :  { %512 = vmatpush.msra.mxu1 %v849_v21 }
  0x22   :  { %566 = vmatpush.msrb.mxu2 %v845_v17 }
  0x23   :  { %191 = vmatmul.f32.vlgmr.msrb.gmra.mxu0 %v65_v5  ;;  %217 = vmatmul.f32.vlgmr.msrb.gmra.mxu1 %v65_v5 }
  0x24   :  { %567 = vmatpush.msrb.mxu2 %v849_v21 }
  0x2b   :  { %195 = vmatmul.f32.gmra.mxu0 %v73_v9  ;;  %221 = vmatmul.f32.gmra.mxu1 %v73_v9 }
  0x8f   :  { %v105_v27 = vpop.f32.mrf.mxu1 }
  0x90   :  { %v71_v26 = vpop.f32.mrf.mxu0  ;;  %v133_v28 = vpop.f32.mrf.mxu2 }
  0x91   :  { %v72_v29 = vadd.f32 %v693_v25, %v71_v26 }
  0x92   :  { %v162_v37 = vpop.f32.mrf.mxu3 }
  0x93   :  { %v106_v30 = vadd.f32 %v105_v27, %v72_v29 }
  0x95   :  { %v134_v35 = vadd.f32 %v133_v28, %v106_v30 }
  0x97   :  { %v163_v39 = vadd.f32 %v162_v37, %v134_v35 }
  0x98   :  { %v79_v31 = vpop.f32.mrf.mxu0  ;;  %v109_v32 = vpop.f32.mrf.mxu1 }
  0x99   :  { %v80_v33 = vadd.f32 %v693_v25, %v79_v31  ;;  %v138_v34 = vpop.f32.mrf.mxu2 }
  0x9a   :  { %v891_v60 = vpop.f32.mrf.mxu3 }
  0x9b   :  { %v110_v36 = vadd.f32 %v109_v32, %v80_v33 }
  0x9d   :  { %v877_v38 = vadd.f32 %v138_v34, %v110_v36 }
  0xa0   :  { %v192_v40 = vpop.f32.mrf.mxu0  ;;  %v218_v41 = vpop.f32.mrf.mxu1 }
  0xa1   :  { %v193_v42 = vadd.f32 %v192_v40, %v163_v39  ;;  %v250_v43 = vpop.f32.mrf.mxu2 }
  0xa3   :  { %v879_v44 = vadd.f32 %v218_v41, %v193_v42 }
  0xa5   :  { %v253_v45 = vadd.f32 %v250_v43, %v879_v44 }
  0xa7   :  { %694 = vtanh.f32 %v253_v45  ;;  %v254_v47 = vmul.f32 0.5, %v253_v45 }
  0xa9   :  { %696 = vtanh.f32 %v254_v47 }
  0xad   :  { %v695_v46 = vpop.eup %694 }
  0xae   :  { %261 = vrot.lane.b32.xlu0 %v695_v46, %s798_s3 }
  0xaf   :  { %v697_v48 = vpop.eup %696 }
  0xb0   :  { %v256_v49 = vadd.f32 1.0, %v697_v48 }
  0xb2   :  { %v257_v50 = vmul.f32 0.5, %v256_v49 }
  0xb4   :  { %v259_v53 = vmul.f32 0.0, %v257_v50 }
 0x120   :  { %v262_v51 = vpop.permute.xlu0 %261 }
 0x121   :  { %v264_v52 = vmul.f32 %v262_v51, %v257_v50 }
 0x123   :  { %266 = vrot.lane.b32.xlu0 %v264_v52, %s799_s27 }
 0x195   :  { %v267_v54 = vpop.permute.xlu0 %266 }
 0x196   :  { %v269_v55 = vadd.f32 %v267_v54, %v259_v53 }
 0x198   :  { %698 = vtanh.f32 %v269_v55  ;;  %v311_v7 = vrot.slane %v269_v55, 6  ;;  %v196_v55 = vpop.f32.mrf.mxu0 }
 0x19e   :  { %v699_v56 = vpop.eup %698 }
 0x19f   :  { %272 = vrot.lane.b32.xlu1 %v699_v56, %s798_s3  ;;  %v169_v56 = vadd.f32 %v891_v60, %v877_v38 }
 0x211   :  { %v273_v57 = vpop.permute.xlu1 %272 }
 0x212   :  { %v275_v58 = vmul.f32 %v273_v57, %v257_v50  ;;  %v197_v57 = vadd.f32 %v196_v55, %v169_v56 }
 0x214   :  { %277 = vrot.lane.b32.xlu1 %v275_v58, %s799_s27  ;;  %v222_v58 = vpop.f32.mrf.mxu1 }
 0x286   :  { %v278_v59 = vpop.permute.xlu1 %277 }
 0x287   :  { %679 = vmatmul.msk.f32.vlgmr.msrb.gmra.mxu3 %vm229_vm1, %v278_v59  ;;  %v913_v59 = vadd.f32 %v222_v58, %v197_v57 }
 0x288   :  { %619 = vmatpush.msrb.mxu3 %v838_v8 }
 0x28a   :  { %620 = vmatpush.msrb.mxu3 %v841_v12 }
 0x28c   :  { %621 = vmatpush.msrb.mxu3 %v845_v17 }
 0x28e   :  { %622 = vmatpush.msrb.mxu3 %v849_v21 }
 0x30a   :  { %v298_v61 = vpop.f32.mrf.mxu3 }
 0x30b   :  { %v302_v62 = vrot.slane %v298_v61, 6 }
 0x30d   :  { %v304_v63 = vadd.f32 %v302_v62, %v879_v44 }
 0x30f   :  { %700 = vtanh.f32 %v304_v63  ;;  %v305_v1 = vmul.f32 0.5, %v304_v63 }
 0x311   :  { %702 = vtanh.f32 %v305_v1 }
 0x315   :  { %v701_v0 = vpop.eup %700 }
 0x316   :  { %315 = vrot.lane.b32.xlu2 %v701_v0, %s798_s3 }
 0x317   :  { %v703_v2 = vpop.eup %702 }
 0x318   :  { %v307_v3 = vadd.f32 1.0, %v703_v2 }
 0x31a   :  { %v308_v4 = vmul.f32 0.5, %v307_v3 }
 0x31c   :  { %v313_v8 = vmul.f32 %v311_v7, %v308_v4 }
 0x370   :  { %v316_v5 = vpop.permute.xlu2 %315 }
 0x371   :  { %v318_v6 = vmul.f32 %v316_v5, %v308_v4 }
 0x373   :  { %320 = vrot.lane.b32.xlu2 %v318_v6, %s799_s27 }
 0x3cd   :  { %v321_v9 = vpop.permute.xlu2 %320 }
 0x3ce   :  { %v323_v10 = vadd.f32 %v321_v9, %v313_v8 }
 0x3d0   :  { %704 = vtanh.f32 %v323_v10  ;;  %v366_v26 = vrot.slane %v323_v10, 6 }
 0x3d6   :  { %v705_v11 = vpop.eup %704 }
 0x3d7   :  { %326 = vrot.lane.b32.xlu0 %v705_v11, %s798_s3 }
 0x449   :  { %v327_v12 = vpop.permute.xlu0 %326 }
 0x44a   :  { %v329_v13 = vmul.f32 %v327_v12, %v308_v4 }
 0x44c   :  { %v331_v14 = vrot.slane %v329_v13, 2 }
 0x44e   :  { %332 = vrot.lane.b32.xlu1 %v331_v14, %s799_s27 }
 0x4c0   :  { %v333_v15 = vpop.permute.xlu1 %332 }
 0x4c1   :  { %680 = vmatmul.msk.f32.vlgmr.msra.gmra.mxu2 %vm229_vm1, %v333_v15 }
 0x544   :  { %v353_v16 = vpop.f32.mrf.mxu2 }
 0x545   :  { %v357_v17 = vrot.slane %v353_v16, 4 }
 0x547   :  { %v359_v18 = vadd.f32 %v357_v17, %v879_v44 }
 0x549   :  { %706 = vtanh.f32 %v359_v18  ;;  %v360_v20 = vmul.f32 0.5, %v359_v18 }
 0x54b   :  { %708 = vtanh.f32 %v360_v20 }
 0x54f   :  { %v707_v19 = vpop.eup %706 }
 0x550   :  { %370 = vrot.lane.b32.xlu2 %v707_v19, %s798_s3 }
 0x551   :  { %v709_v21 = vpop.eup %708 }
 0x552   :  { %v362_v22 = vadd.f32 1.0, %v709_v21 }
 0x554   :  { %v363_v23 = vmul.f32 0.5, %v362_v22 }
 0x556   :  { %v368_v27 = vmul.f32 %v366_v26, %v363_v23 }
 0x5aa   :  { %v371_v24 = vpop.permute.xlu2 %370 }
 0x5ab   :  { %v373_v25 = vmul.f32 %v371_v24, %v363_v23 }
 0x5ad   :  { %375 = vrot.lane.b32.xlu0 %v373_v25, %s799_s27 }
 0x61f   :  { %v376_v28 = vpop.permute.xlu0 %375 }
 0x620   :  { %v378_v29 = vadd.f32 %v376_v28, %v368_v27 }
 0x622   :  { %710 = vtanh.f32 %v378_v29  ;;  %v421_v47 = vrot.slane %v378_v29, 6 }
 0x628   :  { %v711_v30 = vpop.eup %710 }
 0x629   :  { %381 = vrot.lane.b32.xlu1 %v711_v30, %s798_s3 }
 0x69b   :  { %v382_v31 = vpop.permute.xlu1 %381 }
 0x69c   :  { %v384_v32 = vmul.f32 %v382_v31, %v363_v23 }
 0x69e   :  { %v386_v33 = vrot.slane %v384_v32, 4 }
 0x6a0   :  { %387 = vrot.lane.b32.xlu2 %v386_v33, %s799_s27 }
 0x6fa   :  { %v388_v34 = vpop.permute.xlu2 %387 }
 0x6fb   :  { %681 = vmatmul.msk.f32.vlgmr.msra.gmra.mxu3 %vm229_vm1, %v388_v34 }
 0x77e   :  { %v408_v35 = vpop.f32.mrf.mxu3 }
 0x77f   :  { %v412_v36 = vrot.slane %v408_v35, 2 }
 0x781   :  { %v414_v37 = vadd.f32 %v412_v36, %v879_v44 }
 0x783   :  { %712 = vtanh.f32 %v414_v37  ;;  %v415_v40 = vmul.f32 0.5, %v414_v37 }
 0x785   :  { %714 = vtanh.f32 %v415_v40 }
 0x789   :  { %v713_v39 = vpop.eup %712 }
 0x78a   :  { %425 = vrot.lane.b32.xlu0 %v713_v39, %s798_s3 }
 0x78b   :  { %v715_v41 = vpop.eup %714 }
 0x78c   :  { %v417_v42 = vadd.f32 1.0, %v715_v41 }
 0x78e   :  { %v418_v43 = vmul.f32 0.5, %v417_v42 }
 0x790   :  { %v423_v48 = vmul.f32 %v421_v47, %v418_v43 }
 0x7fc   :  { %v426_v45 = vpop.permute.xlu0 %425 }
 0x7fd   :  { %v428_v46 = vmul.f32 %v426_v45, %v418_v43 }
 0x7ff   :  { %430 = vrot.lane.b32.xlu1 %v428_v46, %s799_s27 }
 0x871   :  { %v431_v49 = vpop.permute.xlu1 %430 }
 0x872   :  { %v433_v50 = vadd.f32 %v431_v49, %v423_v48 }
 0x874   :  { %716 = vtanh.f32 %v433_v50  ;;  %v473_v38 = vrot.slane %v433_v50, 6 }
 0x87a   :  { %v717_v51 = vpop.eup %716 }
 0x87b   :  { %436 = vrot.lane.b32.xlu2 %v717_v51, %s798_s3 }
 0x8d5   :  { %v437_v44 = vpop.permute.xlu2 %436 }
 0x8d6   :  { %v439_v52 = vmul.f32 %v437_v44, %v418_v43 }
 0x8d8   :  { %v441_v53 = vrot.slane %v439_v52, 6 }
 0x8da   :  { %442 = vrot.lane.b32.xlu0 %v441_v53, %s799_s27 }
 0x94c   :  { %v443_v54 = vpop.permute.xlu0 %442 }
 0x94d   :  { %682 = vmatmul.msk.f32.vlgmr.msra.gmra.mxu0 %vm229_vm1, %v443_v54 }
 0x9ca   :  { %v463_v61 = vpop.f32.mrf.mxu0 }
 0x9cb   :  { %v466_v62 = vadd.f32 %v463_v61, %v913_v59 }
 0x9cd   :  { %718 = vtanh.f32 %v466_v62  ;;  %v467_v0 = vmul.f32 0.5, %v466_v62 }
 0x9cf   :  { %720 = vtanh.f32 %v467_v0 }
 0x9d3   :  { %v719_v63 = vpop.eup %718 }
 0x9d4   :  { %477 = vrot.lane.b32.xlu1 %v719_v63, %s798_s3 }
 0x9d5   :  { %v721_v1 = vpop.eup %720 }
 0x9d6   :  { %v469_v2 = vadd.f32 1.0, %v721_v1 }
 0x9d8   :  { %v470_v3 = vmul.f32 0.5, %v469_v2 }
 0x9da   :  { %v475_v60 = vmul.f32 %v473_v38, %v470_v3 }
 0xa46   :  { %v478_v4 = vpop.permute.xlu1 %477 }
 0xa47   :  { %v480_v5 = vmul.f32 %v478_v4, %v470_v3 }
 0xa49   :  { %482 = vrot.lane.b32.xlu2 %v480_v5, %s799_s27 }
 0xaa3   :  { %v483_v6 = vpop.permute.xlu2 %482 }
 0xaa4   :  { %v485_v7 = vadd.f32 %v483_v6, %v475_v60 }
 0xaa6   :  { %722 = vtanh.f32 %v485_v7  ;;  %v527_v22 = vrot.slane %v485_v7, 6 }
 0xaac   :  { %v723_v8 = vpop.eup %722 }
 0xaad   :  { %488 = vrot.lane.b32.xlu0 %v723_v8, %s798_s3 }
 0xb1f   :  { %v489_v9 = vpop.permute.xlu0 %488 }
 0xb20   :  { %v491_v10 = vmul.f32 %v489_v9, %v470_v3 }
 0xb22   :  { %493 = vrot.lane.b32.xlu1 %v491_v10, %s799_s27 }
 0xb94   :  { %v494_v11 = vpop.permute.xlu1 %493 }
 0xb95   :  { %683 = vmatmul.msk.f32.vlgmr.msra.gmra.mxu1 %vm229_vm1, %v494_v11 }
 0xc12   :  { %v514_v12 = vpop.f32.mrf.mxu1 }
 0xc13   :  { %v518_v13 = vrot.slane %v514_v12, 6 }
 0xc15   :  { %v520_v14 = vadd.f32 %v518_v13, %v913_v59 }
 0xc17   :  { %724 = vtanh.f32 %v520_v14  ;;  %v521_v16 = vmul.f32 0.5, %v520_v14 }
 0xc19   :  { %726 = vtanh.f32 %v521_v16 }
 0xc1d   :  { %v725_v15 = vpop.eup %724 }
 0xc1e   :  { %531 = vrot.lane.b32.xlu2 %v725_v15, %s798_s3 }
 0xc1f   :  { %v727_v17 = vpop.eup %726 }
 0xc20   :  { %v523_v18 = vadd.f32 1.0, %v727_v17 }
 0xc22   :  { %v524_v19 = vmul.f32 0.5, %v523_v18 }
 0xc24   :  { %v529_v23 = vmul.f32 %v527_v22, %v524_v19 }
 0xc78   :  { %v532_v20 = vpop.permute.xlu2 %531 }
 0xc79   :  { %v534_v21 = vmul.f32 %v532_v20, %v524_v19 }
 0xc7b   :  { %536 = vrot.lane.b32.xlu0 %v534_v21, %s799_s27 }
 0xced   :  { %v537_v24 = vpop.permute.xlu0 %536 }
 0xcee   :  { %v539_v25 = vadd.f32 %v537_v24, %v529_v23 }
 0xcf0   :  { %728 = vtanh.f32 %v539_v25  ;;  %v582_v42 = vrot.slane %v539_v25, 6 }
 0xcf6   :  { %v729_v26 = vpop.eup %728 }
 0xcf7   :  { %542 = vrot.lane.b32.xlu1 %v729_v26, %s798_s3 }
 0xd69   :  { %v543_v27 = vpop.permute.xlu1 %542 }
 0xd6a   :  { %v545_v28 = vmul.f32 %v543_v27, %v524_v19 }
 0xd6c   :  { %v547_v29 = vrot.slane %v545_v28, 2 }
 0xd6e   :  { %548 = vrot.lane.b32.xlu2 %v547_v29, %s799_s27 }
 0xdc8   :  { %v549_v30 = vpop.permute.xlu2 %548 }
 0xdc9   :  { %684 = vmatmul.msk.f32.vlgmr.msrb.gmra.mxu2 %vm229_vm1, %v549_v30 }
 0xe4c   :  { %v569_v31 = vpop.f32.mrf.mxu2 }
 0xe4d   :  { %v573_v32 = vrot.slane %v569_v31, 4 }
 0xe4f   :  { %v575_v33 = vadd.f32 %v573_v32, %v913_v59 }
 0xe51   :  { %730 = vtanh.f32 %v575_v33  ;;  %v576_v35 = vmul.f32 0.5, %v575_v33 }
 0xe53   :  { %732 = vtanh.f32 %v576_v35 }
 0xe57   :  { %v731_v34 = vpop.eup %730 }
 0xe58   :  { %586 = vrot.lane.b32.xlu0 %v731_v34, %s798_s3 }
 0xe59   :  { %v733_v36 = vpop.eup %732 }
 0xe5a   :  { %v578_v37 = vadd.f32 1.0, %v733_v36 }
 0xe5c   :  { %v579_v39 = vmul.f32 0.5, %v578_v37 }
 0xe5e   :  { %v584_v43 = vmul.f32 %v582_v42, %v579_v39 }
 0xeca   :  { %v587_v40 = vpop.permute.xlu0 %586 }
 0xecb   :  { %v589_v41 = vmul.f32 %v587_v40, %v579_v39 }
 0xecd   :  { %591 = vrot.lane.b32.xlu1 %v589_v41, %s799_s27 }
 0xf3f   :  { %v592_v45 = vpop.permute.xlu1 %591 }
 0xf40   :  { %v594_v46 = vadd.f32 %v592_v45, %v584_v43 }
 0xf42   :  { %734 = vtanh.f32 %v594_v46  ;;  %v637_v63 = vrot.slane %v594_v46, 6 }
 0xf48   :  { %v735_v47 = vpop.eup %734 }
 0xf49   :  { %597 = vrot.lane.b32.xlu2 %v735_v47, %s798_s3 }
 0xfa3   :  { %v598_v48 = vpop.permute.xlu2 %597 }
 0xfa4   :  { %v600_v49 = vmul.f32 %v598_v48, %v579_v39 }
 0xfa6   :  { %v602_v50 = vrot.slane %v600_v49, 4 }
 0xfa8   :  { %603 = vrot.lane.b32.xlu0 %v602_v50, %s799_s27 }
0x101a   :  { %v604_v51 = vpop.permute.xlu0 %603 }
0x101b   :  { %685 = vmatmul.msk.f32.vlgmr.msrb.gmra.mxu3 %vm229_vm1, %v604_v51 }
0x109e   :  { %v624_v44 = vpop.f32.mrf.mxu3 }
0x109f   :  { %v628_v52 = vrot.slane %v624_v44, 2 }
0x10a1   :  { %v630_v53 = vadd.f32 %v628_v52, %v913_v59 }
0x10a3   :  { %736 = vtanh.f32 %v630_v53  ;;  %v631_v55 = vmul.f32 0.5, %v630_v53 }
0x10a5   :  { %738 = vtanh.f32 %v631_v55 }
0x10a9   :  { %v737_v54 = vpop.eup %736 }
0x10aa   :  { %641 = vrot.lane.b32.xlu1 %v737_v54, %s798_s3 }
0x10ab   :  { %v739_v56 = vpop.eup %738 }
0x10ac   :  { %v633_v57 = vadd.f32 1.0, %v739_v56 }
0x10ae   :  { %v634_v58 = vmul.f32 0.5, %v633_v57 }
0x10b0   :  { %v639_v0 = vmul.f32 %v637_v63, %v634_v58 }
0x111c   :  { %v642_v61 = vpop.permute.xlu1 %641 }
0x111d   :  { %v644_v62 = vmul.f32 %v642_v61, %v634_v58 }
0x111f   :  { %646 = vrot.lane.b32.xlu2 %v644_v62, %s799_s27 }
0x1179   :  { %v647_v1 = vpop.permute.xlu2 %646 }
0x117a   :  { %v649_v2 = vadd.f32 %v647_v1, %v639_v0 }
0x117c   :  { %740 = vtanh.f32 %v649_v2 }
0x1182   :  { %v741_v3 = vpop.eup %740 }
0x1183   :  { %652 = vrot.lane.b32.xlu0 %v741_v3, %s798_s3 }
0x11f5   :  { %v653_v59 = vpop.permute.xlu0 %652 }
0x11f6   :  { %v655_v4 = vmul.f32 %v653_v59, %v634_v58 }
0x11f8   :  { %657 = vrot.lane.b32.xlu1 %v655_v4, %s799_s27 }
0x126a   :  { %v658_v5 = vpop.permute.xlu1 %657 }
0x126b   :  { %661 = vst.msk [vmem:[#allocation5 - $0x6] sm:$0xc0] %vm660_vm2, %v658_v5 }
0x126c   :  { %672 = dma.vmem_to_hbm [thread:$0]  %s668_s29, 32, %s670_s6, [#allocation4]  }
0x126d   :  { %792 = dma.done.wait [#allocation4], 32  }
0x126e   :  { %793 = vsyncadd [#allocation4], 4294967264 }
0x126f   :  { %677 = vsyncpa [#allocation3], 1 }
0x1270   :  { %678 = vsyncpa [#allocation4], 1 }

</bundles_post_ra>
